<compile_context>
chip_gen: v7x
topology: tpu7x:2x2x1
jax: 0.10.0
libtpu: 0.0.40
codegen_flags: <defaults>
</compile_context>

<pallas_src>
import jax
import jax.numpy as jnp
from jax.experimental import pallas as pl
from jax.experimental.pallas import tpu as pltpu


LANE = 128   # vreg lane width (last dim)


def _round_up(x, m):
    return ((x + m - 1) // m) * m


def make_fused_gcn_kernel(tm, fhid_p, fout_p, xw_first_1, xw_first_2):
    """Two-pass fused GCN kernel over grid (layer, row_block).

    xw_first_k (static Python bools) pick the cheaper association
    A @ (X @ W) (hoisted once into scratch) vs (A @ X) @ W per layer.
    """
    f32 = jnp.float32
    bf16 = jnp.bfloat16

    def kernel(a_ref, dr_ref, dc_ref, x_ref, w1_ref, w2_ref, o_ref,
               h_ref, p_ref):
        layer = pl.program_id(0)            # 0: conv1, 1: conv2 (outer axis)
        r = pl.program_id(1)                # output-row block (inner axis)
        row0 = pl.multiple_of(r * tm, tm)

        # On-the-fly normalization of this row block of (adj + I):
        #   A_hat[rows, :] = d_row * (adj + I)[rows, :] * d_col
        # VPU work hidden under the MXU; scaling in f32, fed to MXU as bf16.
        a = (a_ref[...].astype(f32) * dr_ref[...] * dc_ref[...]).astype(bf16)

        # ---------- layer 1: H[rows] = relu(A_hat[rows] @ X @ W1) ----------
        @pl.when(layer == 0)
        def _conv1():
            if xw_first_1:
                # Hoist P = X @ W1 once (first row block), reuse for all rows.
                @pl.when(r == 0)
                def _():
                    p = jnp.dot(x_ref[...], w1_ref[...],
                                preferred_element_type=f32)
                    p_ref[:, :fhid_p] = p.astype(bf16)
                h = jnp.dot(a, p_ref[:, :fhid_p], preferred_element_type=f32)
            else:
                ax = jnp.dot(a, x_ref[...], preferred_element_type=f32)
                h = jnp.dot(ax.astype(bf16), w1_ref[...],
                            preferred_element_type=f32)
            # relu in f32 (v5e has no bf16 VPU); H stored bf16 in VMEM scratch
            # — it never round-trips through HBM.
            h_ref[pl.ds(row0, tm), :] = jnp.maximum(h, 0.0).astype(bf16)

        # ---------- layer 2: O[rows] = relu(A_hat[rows] @ H @ W2) ----------
        # (o_ref is only written here; layer-0 steps leave it untouched and
        #  the same output block is revisited / overwritten during layer 1.)
        @pl.when(layer == 1)
        def _conv2():
            if xw_first_2:
                @pl.when(r == 0)
                def _():
                    p = jnp.dot(h_ref[...], w2_ref[...],
                                preferred_element_type=f32)
                    p_ref[:, :fout_p] = p.astype(bf16)
                o = jnp.dot(a, p_ref[:, :fout_p], preferred_element_type=f32)
            else:
                ah = jnp.dot(a, h_ref[...], preferred_element_type=f32)
                o = jnp.dot(ah.astype(bf16), w2_ref[...],
                            preferred_element_type=f32)
            o_ref[...] = jnp.maximum(o, 0.0).astype(o_ref.dtype)

    return kernel


def net_forward(adj, x, w1, w2, *, n_align=128):
    """relu(A_hat @ relu(A_hat @ X @ W1) @ W2), fused in one pallas_call.

    n_align=128 gives dense lanes / full passes on v5e's 128-wide MXU; pass
    n_align=256 on v6e/v7x to fully fill their 256-wide MXU for large graphs.
    """
    n = adj.shape[0]
    f_in, f_hid = w1.shape
    f_hid2, f_out = w2.shape
    assert f_hid2 == f_hid and x.shape == (n, f_in) and adj.shape == (n, n)

    f32, bf16 = jnp.float32, jnp.bfloat16

    n_p = _round_up(n, max(n_align, LANE))
    fin_p = _round_up(f_in, LANE)
    fhid_p = _round_up(f_hid, LANE)
    fout_p = _round_up(f_out, LANE)

    # Row-block size: largest MXU-friendly tile that divides n_p.
    tm = max(t for t in (512, 256, 128) if n_p % t == 0)
    n_blocks = n_p // tm

    # D^{-1/2} from the raw adjacency (torch: D = diag(sum(adj, 1))).
    # deg == 0 guard: torch would produce inf; isolated nodes scale to 0 here.
    deg = jnp.sum(adj.astype(f32), axis=1)
    d_inv_sqrt = jnp.where(deg > 0, 1.0 / jnp.sqrt(jnp.maximum(deg, 1e-30)), 0.0)
    d_pad = jnp.pad(d_inv_sqrt, (0, n_p - n))

    # Zero padding is exact (zero rows/cols contribute nothing, relu(0) == 0).
    # bf16 operands everywhere; accumulation stays f32 inside the kernel.
    a_raw = jnp.pad((adj.astype(f32) + jnp.eye(n, dtype=f32)).astype(bf16),
                    ((0, n_p - n), (0, n_p - n)))
    x_p = jnp.pad(x.astype(bf16), ((0, n_p - n), (0, fin_p - f_in)))
    w1_p = jnp.pad(w1.astype(bf16), ((0, fin_p - f_in), (0, fhid_p - f_hid)))
    w2_p = jnp.pad(w2.astype(bf16), ((0, fhid_p - f_hid), (0, fout_p - f_out)))
    d_row = d_pad[:, None].astype(f32)     # (n_p, 1)  per-row-block scale
    d_col = d_pad[None, :].astype(f32)     # (1, n_p)  resident column scale

    # Cheaper matmul association per layer, judged on padded (MXU) shapes.
    xw_first_1 = fhid_p <= fin_p
    xw_first_2 = fout_p <= fhid_p

    # Grid: (layer, row block).  Layer is the OUTER axis so every row of H is
    # in scratch before any layer-2 block reads it; the inner row axis streams
    # A row blocks so their DMA overlaps MXU compute (Pallas double-buffers).
    grid = (2, n_blocks)

    out_p = pl.pallas_call(
        make_fused_gcn_kernel(tm, fhid_p, fout_p, xw_first_1, xw_first_2),
        out_shape=jax.ShapeDtypeStruct((n_p, fout_p), f32),
        grid_spec=pltpu.PrefetchScalarGridSpec(
            num_scalar_prefetch=0,
            grid=grid,
            in_specs=[
                # A + I: streamed one (tm, n_p) row block per step.
                pl.BlockSpec((tm, n_p), lambda l, r: (r, 0)),
                pl.BlockSpec((tm, 1), lambda l, r: (r, 0)),       # d^-1/2 rows
                pl.BlockSpec((1, n_p), lambda l, r: (0, 0)),      # d^-1/2 cols
                # Small resident operands (block index never changes so they
                # are DMA'd once; their default double-buffers are negligible
                # next to A/H — pl.Buffered(1) could shave them further).
                pl.BlockSpec((n_p, fin_p), lambda l, r: (0, 0)),    # X
                pl.BlockSpec((fin_p, fhid_p), lambda l, r: (0, 0)),  # W1
                pl.BlockSpec((fhid_p, fout_p), lambda l, r: (0, 0)),  # W2
            ],
            out_specs=pl.BlockSpec((tm, fout_p), lambda l, r: (r, 0)),
            scratch_shapes=[
                pltpu.VMEM((n_p, fhid_p), bf16),                # H, stays on-chip
                pltpu.VMEM((n_p, max(fhid_p, fout_p)), bf16),   # hoisted X@W1 / H@W2
            ],
        ),
        compiler_params=pltpu.CompilerParams(
            # Both axes sequential: layer 2 needs all of H (per-core scratch).
            dimension_semantics=("arbitrary", "arbitrary"),
            # Default scoped VMEM (16-32 MiB) is far below physical; 64 MiB is
            # safe on all of v5e / v6e / v7x and keeps H + streamed A resident.
            vmem_limit_bytes=64 * 1024 * 1024,
        ),
    )(a_raw, d_row, d_col, x_p, w1_p, w2_p)

    return out_p[:n, :f_out]


if __name__ == "__main__":
    key = jax.random.PRNGKey(0)
    k_adj, k_x, k_w1, k_w2 = jax.random.split(key, 4)

    # Small synthetic graph: 8 nodes, 16 input features, 32 hidden, 8 outputs.
    n_nodes, num_feat, num_hid, num_out = 8, 16, 32, 8

    # Random symmetric positive adjacency (degrees > 0, so D is invertible).
    adj_raw = jax.random.uniform(k_adj, (n_nodes, n_nodes), dtype=jnp.float32)
    adj = 0.5 * (adj_raw + adj_raw.T)

    # nn.Parameter(torch.rand(in, out)) -> uniform [0, 1)
    w1 = jax.random.uniform(k_w1, (num_feat, num_hid), dtype=jnp.float32)
    w2 = jax.random.uniform(k_w2, (num_hid, num_out), dtype=jnp.float32)
    x = jax.random.uniform(k_x, (n_nodes, num_feat), dtype=jnp.float32)

    out = jax.block_until_ready(net_forward(adj, x, w1, w2))

    # Pure-JAX f32 reference using the original PyTorch construction.
    d = jnp.diag(1.0 / jnp.sqrt(jnp.sum(adj, axis=1)))
    a_hat = d @ (adj + jnp.eye(n_nodes, dtype=jnp.float32)) @ d
    ref = jnp.maximum(a_hat @ x @ w1, 0.0)
    ref = jnp.maximum(a_hat @ ref @ w2, 0.0)

    assert out.shape == (n_nodes, num_out)
    rel_err = float(jnp.max(jnp.abs(out - ref) / (jnp.abs(ref) + 1.0)))
    # bf16 operands with f32 accumulation: expect well under 1% relative error.
    assert rel_err < 5e-2, rel_err
    print("KERNEL_OK")
</pallas_src>

<mosaic_0001>
module attributes {stable_mosaic.version = 11 : i64} {
  func.func @kernel(%arg0: i32, %arg1: i32, %arg2: memref<128x128xbf16, #tpu.memory_space<vmem>>, %arg3: memref<128x1xf32, #tpu.memory_space<vmem>>, %arg4: memref<1x128xf32, #tpu.memory_space<vmem>>, %arg5: memref<128x128xbf16, #tpu.memory_space<vmem>>, %arg6: memref<128x128xbf16, #tpu.memory_space<vmem>>, %arg7: memref<128x128xbf16, #tpu.memory_space<vmem>>, %arg8: memref<128x128xf32, #tpu.memory_space<vmem>>, %arg9: memref<128x128xbf16, #tpu.memory_space<vmem>>, %arg10: memref<128x128xbf16, #tpu.memory_space<vmem>>) attributes {dimension_semantics = [#tpu.dimension_semantics<arbitrary>, #tpu.dimension_semantics<arbitrary>], iteration_bounds = array<i64: 2, 1>, scalar_prefetch = 0 : i64, scratch_operands = 2 : i64, tpu.core_type = #tpu.core_type<tc>, window_params = [{transform_indices = @transform_0, window_bounds = array<i64: 128, 128>}, {transform_indices = @transform_1, window_bounds = array<i64: 128, 1>}, {pipeline_mode = #tpu.pipeline_mode<synchronous>, transform_indices = @transform_2, window_bounds = array<i64: 1, 128>}, {pipeline_mode = #tpu.pipeline_mode<synchronous>, transform_indices = @transform_3, window_bounds = array<i64: 128, 128>}, {pipeline_mode = #tpu.pipeline_mode<synchronous>, transform_indices = @transform_4, window_bounds = array<i64: 128, 128>}, {pipeline_mode = #tpu.pipeline_mode<synchronous>, transform_indices = @transform_5, window_bounds = array<i64: 128, 128>}, {transform_indices = @transform_6, window_bounds = array<i64: 128, 128>}]} {
    %c128_i32 = arith.constant 128 : i32
    %0 = arith.muli %arg1, %c128_i32 : i32
    %1 = tpu.assume_multiple %0, 128 : i32
    %c0 = arith.constant 0 : index
    %c0_0 = arith.constant 0 : index
    %2 = vector.load %arg2[%c0, %c0_0] : memref<128x128xbf16, #tpu.memory_space<vmem>>, vector<128x128xbf16>
    %3 = arith.extf %2 : vector<128x128xbf16> to vector<128x128xf32>
    %c0_1 = arith.constant 0 : index
    %c0_2 = arith.constant 0 : index
    %4 = vector.load %arg3[%c0_1, %c0_2] : memref<128x1xf32, #tpu.memory_space<vmem>>, vector<128x1xf32>
    %5 = vector.broadcast %4 : vector<128x1xf32> to vector<128x128xf32>
    %6 = arith.mulf %3, %5 : vector<128x128xf32>
    %c0_3 = arith.constant 0 : index
    %c0_4 = arith.constant 0 : index
    %7 = vector.load %arg4[%c0_3, %c0_4] : memref<1x128xf32, #tpu.memory_space<vmem>>, vector<1x128xf32>
    %8 = vector.broadcast %7 : vector<1x128xf32> to vector<128x128xf32>
    %9 = arith.mulf %6, %8 : vector<128x128xf32>
    %10 = arith.truncf %9 : vector<128x128xf32> to vector<128x128xbf16>
    %c0_i32 = arith.constant 0 : i32
    %11 = arith.cmpi eq, %arg0, %c0_i32 : i32
    %12 = arith.extui %11 : i1 to i32
    %c0_i32_5 = arith.constant 0 : i32
    %13 = arith.cmpi ne, %12, %c0_i32_5 : i32
    scf.if %13 {
      %c0_i32_7 = arith.constant 0 : i32
      %17 = arith.cmpi eq, %arg1, %c0_i32_7 : i32
      %18 = arith.extui %17 : i1 to i32
      %c0_i32_8 = arith.constant 0 : i32
      %19 = arith.cmpi ne, %18, %c0_i32_8 : i32
      scf.if %19 {
        %c0_13 = arith.constant 0 : index
        %c0_14 = arith.constant 0 : index
        %27 = vector.load %arg5[%c0_13, %c0_14] : memref<128x128xbf16, #tpu.memory_space<vmem>>, vector<128x128xbf16>
        %c0_15 = arith.constant 0 : index
        %c0_16 = arith.constant 0 : index
        %28 = vector.load %arg6[%c0_15, %c0_16] : memref<128x128xbf16, #tpu.memory_space<vmem>>, vector<128x128xbf16>
        %cst_17 = arith.constant dense<0.000000e+00> : vector<128x128xf32>
        %29 = tpu.matmul %27, %28, %cst_17 {dimension_numbers = #tpu.dot_dimension_numbers<[1], [0], [0], [1], [0, 0, 1, 1], [], []>} : vector<128x128xbf16>, vector<128x128xbf16>, vector<128x128xf32> -> vector<128x128xf32>
        %30 = arith.truncf %29 : vector<128x128xf32> to vector<128x128xbf16>
        %c0_18 = arith.constant 0 : index
        %c0_19 = arith.constant 0 : index
        %31 = vector.load %arg10[%c0_18, %c0_19] : memref<128x128xbf16, #tpu.memory_space<vmem>>, vector<128x128xbf16>
        tpu.vector_store %arg10[%c0_18, %c0_19], %30 {strides = array<i32>} : memref<128x128xbf16, #tpu.memory_space<vmem>>, vector<128x128xbf16>,
      } else {
      }
      %c0_9 = arith.constant 0 : index
      %c0_10 = arith.constant 0 : index
      %20 = vector.load %arg10[%c0_9, %c0_10] : memref<128x128xbf16, #tpu.memory_space<vmem>>, vector<128x128xbf16>
      %cst = arith.constant dense<0.000000e+00> : vector<128x128xf32>
      %21 = tpu.matmul %10, %20, %cst {dimension_numbers = #tpu.dot_dimension_numbers<[1], [0], [0], [1], [0, 0, 1, 1], [], []>} : vector<128x128xbf16>, vector<128x128xbf16>, vector<128x128xf32> -> vector<128x128xf32>
      %cst_11 = arith.constant 0.000000e+00 : f32
      %22 = vector.broadcast %cst_11 : f32 to vector<128x128xf32>
      %23 = arith.maximumf %21, %22 : vector<128x128xf32>
      %24 = arith.truncf %23 : vector<128x128xf32> to vector<128x128xbf16>
      %25 = arith.index_cast %1 : i32 to index
      %c0_12 = arith.constant 0 : index
      %26 = vector.load %arg9[%25, %c0_12] : memref<128x128xbf16, #tpu.memory_space<vmem>>, vector<128x128xbf16>
      tpu.vector_store %arg9[%25, %c0_12], %24 {strides = array<i32>} : memref<128x128xbf16, #tpu.memory_space<vmem>>, vector<128x128xbf16>,
    } else {
    }
    %c1_i32 = arith.constant 1 : i32
    %14 = arith.cmpi eq, %arg0, %c1_i32 : i32
    %15 = arith.extui %14 : i1 to i32
    %c0_i32_6 = arith.constant 0 : i32
    %16 = arith.cmpi ne, %15, %c0_i32_6 : i32
    scf.if %16 {
      %c0_i32_7 = arith.constant 0 : i32
      %17 = arith.cmpi eq, %arg1, %c0_i32_7 : i32
      %18 = arith.extui %17 : i1 to i32
      %c0_i32_8 = arith.constant 0 : i32
      %19 = arith.cmpi ne, %18, %c0_i32_8 : i32
      scf.if %19 {
        %c0_14 = arith.constant 0 : index
        %c0_15 = arith.constant 0 : index
        %25 = vector.load %arg9[%c0_14, %c0_15] : memref<128x128xbf16, #tpu.memory_space<vmem>>, vector<128x128xbf16>
        %c0_16 = arith.constant 0 : index
        %c0_17 = arith.constant 0 : index
        %26 = vector.load %arg7[%c0_16, %c0_17] : memref<128x128xbf16, #tpu.memory_space<vmem>>, vector<128x128xbf16>
        %cst_18 = arith.constant dense<0.000000e+00> : vector<128x128xf32>
        %27 = tpu.matmul %25, %26, %cst_18 {dimension_numbers = #tpu.dot_dimension_numbers<[1], [0], [0], [1], [0, 0, 1, 1], [], []>} : vector<128x128xbf16>, vector<128x128xbf16>, vector<128x128xf32> -> vector<128x128xf32>
        %28 = arith.truncf %27 : vector<128x128xf32> to vector<128x128xbf16>
        %c0_19 = arith.constant 0 : index
        %c0_20 = arith.constant 0 : index
        %29 = vector.load %arg10[%c0_19, %c0_20] : memref<128x128xbf16, #tpu.memory_space<vmem>>, vector<128x128xbf16>
        tpu.vector_store %arg10[%c0_19, %c0_20], %28 {strides = array<i32>} : memref<128x128xbf16, #tpu.memory_space<vmem>>, vector<128x128xbf16>,
      } else {
      }
      %c0_9 = arith.constant 0 : index
      %c0_10 = arith.constant 0 : index
      %20 = vector.load %arg10[%c0_9, %c0_10] : memref<128x128xbf16, #tpu.memory_space<vmem>>, vector<128x128xbf16>
      %cst = arith.constant dense<0.000000e+00> : vector<128x128xf32>
      %21 = tpu.matmul %10, %20, %cst {dimension_numbers = #tpu.dot_dimension_numbers<[1], [0], [0], [1], [0, 0, 1, 1], [], []>} : vector<128x128xbf16>, vector<128x128xbf16>, vector<128x128xf32> -> vector<128x128xf32>
      %cst_11 = arith.constant 0.000000e+00 : f32
      %22 = vector.broadcast %cst_11 : f32 to vector<128x128xf32>
      %23 = arith.maximumf %21, %22 : vector<128x128xf32>
      %c0_12 = arith.constant 0 : index
      %c0_13 = arith.constant 0 : index
      %24 = vector.load %arg8[%c0_12, %c0_13] : memref<128x128xf32, #tpu.memory_space<vmem>>, vector<128x128xf32>
      tpu.vector_store %arg8[%c0_12, %c0_13], %23 {strides = array<i32>} : memref<128x128xf32, #tpu.memory_space<vmem>>, vector<128x128xf32>,
    } else {
    }
    return
  }
  func.func @transform_0(%arg0: i32, %arg1: i32) -> (i32, i32) {
    %c0_i32 = arith.constant 0 : i32
    %c0_i32_0 = arith.constant 0 : i32
    return %arg1, %c0_i32 : i32, i32
  }
  func.func @transform_1(%arg0: i32, %arg1: i32) -> (i32, i32) {
    %c0_i32 = arith.constant 0 : i32
    %c0_i32_0 = arith.constant 0 : i32
    return %arg1, %c0_i32 : i32, i32
  }
  func.func @transform_2(%arg0: i32, %arg1: i32) -> (i32, i32) {
    %c0_i32 = arith.constant 0 : i32
    %c0_i32_0 = arith.constant 0 : i32
    %c0_i32_1 = arith.constant 0 : i32
    return %c0_i32, %c0_i32_0 : i32, i32
  }
  func.func @transform_3(%arg0: i32, %arg1: i32) -> (i32, i32) {
    %c0_i32 = arith.constant 0 : i32
    %c0_i32_0 = arith.constant 0 : i32
    %c0_i32_1 = arith.constant 0 : i32
    return %c0_i32, %c0_i32_0 : i32, i32
  }
  func.func @transform_4(%arg0: i32, %arg1: i32) -> (i32, i32) {
    %c0_i32 = arith.constant 0 : i32
    %c0_i32_0 = arith.constant 0 : i32
    %c0_i32_1 = arith.constant 0 : i32
    return %c0_i32, %c0_i32_0 : i32, i32
  }
  func.func @transform_5(%arg0: i32, %arg1: i32) -> (i32, i32) {
    %c0_i32 = arith.constant 0 : i32
    %c0_i32_0 = arith.constant 0 : i32
    %c0_i32_1 = arith.constant 0 : i32
    return %c0_i32, %c0_i32_0 : i32, i32
  }
  func.func @transform_6(%arg0: i32, %arg1: i32) -> (i32, i32) {
    %c0_i32 = arith.constant 0 : i32
    %c0_i32_0 = arith.constant 0 : i32
    return %arg1, %c0_i32 : i32, i32
  }
}

</mosaic_0001>

<bundles_post_ra>
// kernel: tpu_custom_call.1
= control target key start
LH: loop header
LB: loop body
LE: loop exit
PB: predicated region body
PF: predicated region fallthrough
CT: control target
= control target key end

     0   :  { %11 = vsyncpa [#allocation5], 0  ;;  %s2328_s0 = inlined_call_operand.hbm [shape: bf16[128,128], index: 0, kind: input, shape index: {}]   ;;  %s2329_s1 = inlined_call_operand.hbm [shape: f32[128,1], index: 1, kind: input, shape index: {}]   ;;  %s2330_s2 = inlined_call_operand.hbm [shape: f32[1,128], index: 2, kind: input, shape index: {}]   ;;  %s2331_s3 = inlined_call_operand.hbm [shape: bf16[128,128], index: 3, kind: input, shape index: {}]   ;;  %s2332_s4 = inlined_call_operand.hbm [shape: bf16[128,128], index: 4, kind: input, shape index: {}]   ;;  %s2333_s5 = inlined_call_operand.hbm [shape: bf16[128,128], index: 5, kind: input, shape index: {}]   ;;  %s2334_s6 = inlined_call_operand.hbm [shape: f32[128,128], index: 6, kind: output, shape index: {}]  }
   0x1   :  { %12 = vsyncpa [#allocation8], 0 }
   0x2   :  { %13 = vsyncpa [#allocation11], 0 }
   0x3   :  { %14 = vsyncpa [#allocation14], 0 }
   0x4   :  { %15 = vsyncpa [#allocation6], 0  ;;  %s2042_s21 = smov 0   ;;  %s2044_s22 = smov 0  }
   0x5   :  { %s2046_s23 = smov 0  }
   0x6 LB: > { %s1993_s24 = smov [#allocation7]   ;;  %s1353_s26 = sadd.s32 4294967295, %s1991_s23   ;;  %s1991_s23 = sphi %s2046_s23, %s21_s23   ;;  %s1987_s22 = sphi %s2044_s22, %s2346_s22   ;;  %s1983_s21 = sphi %s2042_s21, %s2345_s21  }
   0x7   : > { %s231_s25 = sshll.u32 %s1993_s24, 4  ;;  %p1354_p0 = scmp.ge.s32.totalorder %s1991_s23, 1  ;;  %s2066_s25 = int_to_ptr.vmem [resolvable:$true] %s231_s25 }
   0x8   : > { %p200_p1 = scmp.lt.s32.totalorder %s1991_s23, 3  ;;  %p2062_p2 = scmp.eq.s32.totalorder %s1353_s26, 0 }
   0x9   : > { %s1994_s30 = smov [#allocation10]   ;;  %s1755_s10 = scalar_lea.hbm %s2329_s1, 2048 }
   0xa   : > { %s2338_s27 = scalar_select %p2062_p2, 1, 0 }
   0xb   : > { %p2068_p3 = pnand %p1354_p0, %p200_p1  ;;  %s255_s7 = sshll.u32 %s1994_s30, 4  ;;  %s2080_s7 = int_to_ptr.vmem [resolvable:$true] %s255_s7 }
   0xc   : > { %p1756_p6 = scmp.ne.s32.totalorder %s2329_s1, %s1755_s10  ;;  %p1762_p10 = scmp.lt.u32.totalorder %s1755_s10, %s2329_s1 }
   0xd   : > { %s2339_s28 = scalar_select %p2068_p3, 1, 0 }
   0xe   : > { %p1658_p4 = pneg %p2068_p3 }
  0x10   : > { %p2076_p5 = pnand %p2062_p2, %p1658_p4 }
  0x12   : > { %p2090_p7 = pneg %p2076_p5 }
  0x14   : > { %p1758_p8 = pnand %p2090_p7, %p1756_p6 }
  0x16   : > { %p1759_p9 = pneg %p1758_p8 }
  0x18   : > { %p1764_p11 = pnand %p1762_p10, %p1759_p9 }
  0x1a   : > { %1767 = shalt.err (!%p1764_p11)
}
  0x1b   : > { %s1768_s16 = scalar_lea.vmem %s2066_s25, 2048  ;;  %p1776_p1 = scmp.lt.s32.totalorder %s2066_s25, %s2066_s25 }
  0x1c   : > { %p1769_p12 = scmp.ne.s32.totalorder %s2066_s25, %s1768_s16  ;;  %p1777_p4 = scmp.lt.s32.totalorder %s1768_s16, %s1768_s16 }
  0x1e   : > { %p1771_p13 = pnand %p1769_p12, %p2090_p7  ;;  %p1778_p6 = por %p1777_p4, %p1776_p1 }
  0x20   : > { %p1772_p0 = pneg %p1771_p13 }
  0x22   : > { %p1779_p8 = pnand %p1778_p6, %p1772_p0 }
  0x24   : > { %1782 = shalt.err (!%p1779_p8)
}
  0x25   : > { %s1995_s17 = smov 128   ;;  %s1996_s18 = smov 8  }
  0x26   : > { %1664 = dma.hbm_to_vmem [thread:$0]  (!%p2076_p5), %s2329_s1, 2048, %s2066_s25, [#allocation8], %s1995_s17, %s1995_s17, %s1996_s18  }
  0x27   : > { %s1783_s8 = scalar_lea.hbm %s2331_s3, 1024 }
  0x28   : > { %p1784_p9 = scmp.ne.s32.totalorder %s2331_s3, %s1783_s8  ;;  %p1790_p12 = scmp.lt.u32.totalorder %s1783_s8, %s2331_s3 }
  0x2a   : > { %p1786_p10 = pnand %p1784_p9, %p2090_p7 }
  0x2c   : > { %p1787_p11 = pneg %p1786_p10 }
  0x2e   : > { %p1792_p13 = pnand %p1790_p12, %p1787_p11 }
  0x30   : > { %1795 = shalt.err (!%p1792_p13)
}
  0x31   : > { %s1796_s25 = scalar_lea.vmem %s2080_s7, 1024  ;;  %p1804_p6 = scmp.lt.s32.totalorder %s2080_s7, %s2080_s7 }
  0x32   : > { %p1797_p0 = scmp.ne.s32.totalorder %s2080_s7, %s1796_s25  ;;  %p1805_p8 = scmp.lt.s32.totalorder %s1796_s25, %s1796_s25 }
  0x34   : > { %p1799_p1 = pnand %p1797_p0, %p2090_p7  ;;  %p1806_p9 = por %p1805_p8, %p1804_p6 }
  0x36   : > { %p1800_p4 = pneg %p1799_p1 }
  0x38   : > { %p1807_p10 = pnand %p1806_p9, %p1800_p4 }
  0x3a   : > { %1810 = shalt.err (!%p1807_p10)
}
  0x3b   : > { %s1997_s14 = smov 64   ;;  %s1998_s15 = smov 4  }
  0x3c   : > { %1670 = dma.hbm_to_vmem [thread:$0]  (!%p2076_p5), %s2331_s3, 1024, %s2080_s7, [#allocation11], %s1997_s14, %s1997_s14, %s1998_s15  }
  0x3d   : > { %s33_s18 = sadd.s32 1, %s1987_s22  ;;  %s1999_s19 = smov [#allocation4]  }
  0x3e   : > { %p35_p11 = scmp.ge.s32.totalorder %s33_s18, 2  ;;  %s215_s20 = sshll.u32 %s1999_s19, 4  ;;  %s216_s20 = int_to_ptr.vmem [resolvable:$true] %s215_s20 }
  0x3f   : > { %s2000_s24 = smov [#allocation9]   ;;  %s1811_s10 = scalar_lea.hbm %s2328_s0, 1024 }
  0x40   : > { %s2348_s18 = smov (%p35_p11, %s33_s18), 0  ;;  %s245_s30 = sshll.u32 %s2000_s24, 4  ;;  %s246_s30 = int_to_ptr.vmem [resolvable:$true] %s245_s30 }
  0x41   : > { %p1812_p12 = scmp.ne.s32.totalorder %s2328_s0, %s1811_s10  ;;  %p1818_p1 = scmp.lt.u32.totalorder %s1811_s10, %s2328_s0 }
  0x43   : > { %p1814_p13 = pnand %p1812_p12, %p2090_p7 }
  0x45   : > { %p1815_p0 = pneg %p1814_p13 }
  0x47   : > { %p1820_p4 = pnand %p1818_p1, %p1815_p0 }
  0x49   : > { %1823 = shalt.err (!%p1820_p4)
}
  0x4a   : > { %s1824_s16 = scalar_lea.vmem %s216_s20, 1024  ;;  %p1832_p10 = scmp.lt.s32.totalorder %s216_s20, %s216_s20 }
  0x4b   : > { %p1825_p6 = scmp.ne.s32.totalorder %s216_s20, %s1824_s16  ;;  %p1833_p11 = scmp.lt.s32.totalorder %s1824_s16, %s1824_s16 }
  0x4d   : > { %p1827_p8 = pnand %p1825_p6, %p2090_p7  ;;  %p1834_p2 = por %p1833_p11, %p1832_p10 }
  0x4f   : > { %p1828_p9 = pneg %p1827_p8 }
  0x51   : > { %p1835_p3 = pnand %p1834_p2, %p1828_p9 }
  0x53   : > { %1838 = shalt.err (!%p1835_p3)
}
  0x54   : > { %1661 = dma.hbm_to_vmem [thread:$0]  (!%p2076_p5), %s2328_s0, 1024, %s216_s20, [#allocation5], %s1997_s14, %s1997_s14, %s1998_s15  }
  0x55   : > { %s1839_s9 = scalar_lea.hbm %s2330_s2, 16 }
  0x56   : > { %p1840_p2 = scmp.ne.s32.totalorder %s2330_s2, %s1839_s9  ;;  %p1846_p13 = scmp.lt.u32.totalorder %s1839_s9, %s2330_s2 }
  0x58   : > { %p1842_p3 = pnand %p1840_p2, %p2090_p7 }
  0x5a   : > { %p1843_p12 = pneg %p1842_p3 }
  0x5c   : > { %p1848_p0 = pnand %p1846_p13, %p1843_p12 }
  0x5e   : > { %1851 = shalt.err (!%p1848_p0)
}
  0x5f   : > { %s1852_s25 = scalar_lea.vmem %s246_s30, 16  ;;  %s1859_s20 = scalar_lea.vmem %s246_s30, 32 }
  0x60   : > { %p1853_p1 = scmp.ne.s32.totalorder %s246_s30, %s1852_s25  ;;  %p1860_p8 = scmp.lt.s32.totalorder %s246_s30, %s246_s30 }
  0x61   : > { %p1861_p9 = scmp.lt.s32.totalorder %s1859_s20, %s1852_s25 }
  0x62   : > { %p1855_p4 = pnand %p1853_p1, %p2090_p7 }
  0x63   : > { %p1862_p10 = por %p1861_p9, %p1860_p8 }
  0x64   : > { %p1856_p6 = pneg %p1855_p4 }
  0x66   : > { %p1863_p11 = pnand %p1862_p10, %p1856_p6 }
  0x68   : > { %1866 = shalt.err (!%p1863_p11)
}
  0x69   : > { %1667 = dma.hbm_to_vmem [thread:$0]  (!%p2076_p5), %s2330_s2, 16, %s246_s30, [#allocation8]  }
  0x6a   : > { %s2001_s19 = smov [#allocation12]   ;;  %s2002_s8 = smov [#allocation13]  }
  0x6b   : > { %s268_s24 = sshll.u32 %s2001_s19, 4  ;;  %s281_s9 = sshll.u32 %s2002_s8, 4  ;;  %s269_s24 = int_to_ptr.vmem [resolvable:$true] %s268_s24  ;;  %s282_s9 = int_to_ptr.vmem [resolvable:$true] %s281_s9 }
  0x6c   : > { %s1867_s12 = scalar_lea.hbm %s2332_s4, 1024 }
  0x6d   : > { %p1868_p2 = scmp.ne.s32.totalorder %s2332_s4, %s1867_s12  ;;  %p1874_p13 = scmp.lt.u32.totalorder %s1867_s12, %s2332_s4 }
  0x6f   : > { %p1870_p3 = pnand %p1868_p2, %p2090_p7 }
  0x71   : > { %p1871_p12 = pneg %p1870_p3 }
  0x73   : > { %p1876_p0 = pnand %p1874_p13, %p1871_p12 }
  0x75   : > { %1879 = shalt.err (!%p1876_p0)
}
  0x76   : > { %s1880_s30 = scalar_lea.vmem %s269_s24, 1024  ;;  %p1888_p8 = scmp.lt.s32.totalorder %s269_s24, %s269_s24 }
  0x77   : > { %p1881_p1 = scmp.ne.s32.totalorder %s269_s24, %s1880_s30  ;;  %p1889_p9 = scmp.lt.s32.totalorder %s1880_s30, %s1880_s30 }
  0x79   : > { %p1883_p4 = pnand %p1881_p1, %p2090_p7  ;;  %p1890_p10 = por %p1889_p9, %p1888_p8 }
  0x7b   : > { %p1884_p6 = pneg %p1883_p4 }
  0x7d   : > { %p1891_p11 = pnand %p1890_p10, %p1884_p6 }
  0x7f   : > { %1894 = shalt.err (!%p1891_p11)
}
  0x80   : > { %1673 = dma.hbm_to_vmem [thread:$0]  (!%p2076_p5), %s2332_s4, 1024, %s269_s24, [#allocation11], %s1997_s14, %s1997_s14, %s1998_s15  }
  0x81   : > { %s1895_s11 = scalar_lea.hbm %s2333_s5, 1024 }
  0x82   : > { %p1896_p2 = scmp.ne.s32.totalorder %s2333_s5, %s1895_s11  ;;  %p1902_p13 = scmp.lt.u32.totalorder %s1895_s11, %s2333_s5 }
  0x84   : > { %p1898_p3 = pnand %p1896_p2, %p2090_p7 }
  0x86   : > { %p1899_p12 = pneg %p1898_p3 }
  0x88   : > { %p1904_p0 = pnand %p1902_p13, %p1899_p12 }
  0x8a   : > { %1907 = shalt.err (!%p1904_p0)
}
  0x8b   : > { %s1908_s16 = scalar_lea.vmem %s282_s9, 1024  ;;  %p1916_p8 = scmp.lt.s32.totalorder %s282_s9, %s282_s9 }
  0x8c   : > { %p1909_p1 = scmp.ne.s32.totalorder %s282_s9, %s1908_s16  ;;  %p1917_p9 = scmp.lt.s32.totalorder %s1908_s16, %s1908_s16 }
  0x8e   : > { %p1911_p4 = pnand %p1909_p1, %p2090_p7  ;;  %p1918_p10 = por %p1917_p9, %p1916_p8 }
  0x90   : > { %p1912_p6 = pneg %p1911_p4 }
  0x92   : > { %p1919_p11 = pnand %p1918_p10, %p1912_p6 }
  0x94   : > { %1922 = shalt.err (!%p1919_p11)
}
  0x95   : > { %1676 = dma.hbm_to_vmem [thread:$0]  (!%p2076_p5), %s2333_s5, 1024, %s282_s9, [#allocation14], %s1997_s14, %s1997_s14, %s1998_s15  }
  0x96   : > { %p2342_p2 = scmp.ne.s32.totalorder %s2339_s28, 0 }
  0x97   : > { %p2343_p7 = scmp.ne.s32.totalorder (!%p2342_p2), %s2338_s27, 0 }
  0x98   : > { %297 = sbr.rel (%p2342_p2) target bundleno = 1387 (0x56b), region = 44 }
  0x9f   : > { %1962 = dma.done.wait (%p2343_p7), [#allocation5], 1024  }
  0xa0   : > { %1964 = vsyncadd (%p2343_p7), [#allocation5], 4294966272 }
  0xa1   : > { %1966 = dma.done.wait (%p2343_p7), [#allocation8], 2064  }
  0xa2   : > { %1968 = vsyncadd (%p2343_p7), [#allocation8], 4294965232 }
  0xa3   : > { %1970 = dma.done.wait (%p2343_p7), [#allocation11], 2048  }
  0xa4   : > { %1972 = vsyncadd (%p2343_p7), [#allocation11], 4294965248 }
  0xa5   : > { %1974 = dma.done.wait (%p2343_p7), [#allocation14], 1024  }
  0xa6   : > { %1976 = vsyncadd (%p2343_p7), [#allocation14], 4294966272  ;;  %v2003_v0 = vmov 0   ;;  %v376_v1 = vld [vmem:[#allocation7 + $0x10] sm:$0xff]  ;;  %v374_v2 = vld [vmem:[#allocation7] sm:$0xff]  ;;  %p1369_p5 = scmp.ne.s32.totalorder %s1983_s21, 0 }
  0xa7   : > { %1730 = vset.pattern.permute.xlu1 %v2003_v0  ;;  %1729 = vset.pattern.permute.xlu0 %v2003_v0  ;;  %v377_v3 = vld [vmem:[#allocation7 + $0x18] sm:$0xff]  ;;  %v375_v4 = vld [vmem:[#allocation7 + $0x8] sm:$0xff]  ;;  %v378_v6 = vld [vmem:[#allocation7 + $0x20] sm:$0xff] }
  0xa8   : > { %402 = vperm.xlu1 %1730, %v376_v1   ;;  %392 = vperm.xlu0 %1729, %v374_v2   ;;  %v379_v5 = vld [vmem:[#allocation7 + $0x28] sm:$0xff]  ;;  %v381_v7 = vld [vmem:[#allocation7 + $0x38] sm:$0xff]  ;;  %v380_v8 = vld [vmem:[#allocation7 + $0x30] sm:$0xff] }
  0xa9   : > { %v383_v9 = vld [vmem:[#allocation7 + $0x48] sm:$0xff]  ;;  %v382_v10 = vld [vmem:[#allocation7 + $0x40] sm:$0xff]  ;;  %v385_v11 = vld [vmem:[#allocation7 + $0x58] sm:$0xff] }
  0xaa   : > { %v384_v12 = vld [vmem:[#allocation7 + $0x50] sm:$0xff]  ;;  %v387_v13 = vld [vmem:[#allocation7 + $0x68] sm:$0xff]  ;;  %v386_v14 = vld [vmem:[#allocation7 + $0x60] sm:$0xff] }
  0xab   : > { %v389_v15 = vld [vmem:[#allocation7 + $0x78] sm:$0xff]  ;;  %v388_v16 = vld [vmem:[#allocation7 + $0x70] sm:$0xff]  ;;  %v1431_v17 = vld [vmem:[#allocation4 + $0x8] sm:$0xff]  }
  0xac   : > { %407 = vperm.xlu1 %1730, %v377_v3   ;;  %397 = vperm.xlu0 %1729, %v375_v4   ;;  %v1400_v18 = vld [vmem:[#allocation4] sm:$0xff]   ;;  %v1405_v19 = vunpack.c.l.bf16 %v1431_v17  ;;  %v1406_v23 = vunpack.c.h.bf16 %v1431_v17  ;;  %v1432_v25 = vld [vmem:[#allocation4 + $0x10] sm:$0xff]   ;;  %v1433_v35 = vld [vmem:[#allocation4 + $0x18] sm:$0xff]  }
  0xad   : > { %v1401_v20 = vunpack.c.l.bf16 %v1400_v18  ;;  %v1402_v24 = vunpack.c.h.bf16 %v1400_v18  ;;  %v2239_v28 = vld [vmem:[#allocation9] ss:$0 sm:$0xff]  ;;  %v1410_v33 = vunpack.c.h.bf16 %v1432_v25  ;;  %v1409_v34 = vunpack.c.l.bf16 %v1432_v25  ;;  %v1435_v58 = vld [vmem:[#allocation4 + $0x28] sm:$0xff]   ;;  %v1436_v4 = vld [vmem:[#allocation4 + $0x30] sm:$0xff]  }
  0xae   : > { %v1414_v42 = vunpack.c.h.bf16 %v1433_v35  ;;  %v1413_v43 = vunpack.c.l.bf16 %v1433_v35  ;;  %v1434_v48 = vld [vmem:[#allocation4 + $0x20] sm:$0xff]   ;;  %v1422_v63 = vunpack.c.h.bf16 %v1435_v58  ;;  %v1421_v3 = vunpack.c.l.bf16 %v1435_v58 }
  0xaf   : > { %v1418_v53 = vunpack.c.h.bf16 %v1434_v48  ;;  %v1417_v57 = vunpack.c.l.bf16 %v1434_v48  ;;  %v1731_v35 = vld [vmem:[#allocation12] sm:$0xff] (!%p1369_p5)  }
  0xb0   : > { %417 = vperm.xlu1 %1730, %v379_v5   ;;  %412 = vperm.xlu0 %1729, %v378_v6   ;;  %v1743_v48 = vld [vmem:[#allocation10 + $0x20] sm:$0xff] (!%p1369_p5)  }
  0xb1   : > { %1502 = vmatprep.subr.bf16.mxu0 (!%p1369_p5), %v1731_v35 }
  0xb2   : > { %1503 = vmatpush3.bf16.msra.mxu0 (!%p1369_p5), %v1731_v35 }
  0xb4   : > { %427 = vperm.xlu1 %1730, %v381_v7   ;;  %422 = vperm.xlu0 %1729, %v380_v8  }
  0xb8   : > { %437 = vperm.xlu1 %1730, %v383_v9   ;;  %432 = vperm.xlu0 %1729, %v382_v10   ;;  %v1426_v9 = vunpack.c.h.bf16 %v1436_v4 }
  0xbc   : > { %447 = vperm.xlu1 %1730, %v385_v11   ;;  %442 = vperm.xlu0 %1729, %v384_v12  }
  0xc0   : > { %457 = vperm.xlu1 %1730, %v387_v13   ;;  %452 = vperm.xlu0 %1729, %v386_v14   ;;  %v1425_v13 = vunpack.c.l.bf16 %v1436_v4  ;;  %v1437_v14 = vld [vmem:[#allocation4 + $0x38] sm:$0xff]  }
  0xc4   : > { %467 = vperm.xlu1 %1730, %v389_v15   ;;  %462 = vperm.xlu0 %1729, %v388_v16  }
 0x127   : > { %v403_v21 = vpop.permute.xlu1 %402  ;;  %v393_v22 = vpop.permute.xlu0 %392 }
 0x128   : > { %v472_v26 = vmul.f32 %v1405_v19, %v403_v21  ;;  %v470_v27 = vmul.f32 %v1401_v20, %v393_v22  ;;  %v1430_v19 = vunpack.c.h.bf16 %v1437_v14 }
 0x12a   : > { %v495_v36 = vmul.f32 %v2239_v28, %v472_v26  ;;  %v493_v37 = vmul.f32 %v2239_v28, %v470_v27 }
 0x12b   : > { %v408_v29 = vpop.permute.xlu1 %407  ;;  %v398_v30 = vpop.permute.xlu0 %397 }
 0x12c   : > { %v473_v31 = vmul.f32 %v1406_v23, %v408_v29  ;;  %v471_v32 = vmul.f32 %v1402_v24, %v398_v30  ;;  %v1429_v23 = vunpack.c.l.bf16 %v1437_v14 }
 0x12e   : > { %v496_v38 = vmul.f32 %v2239_v28, %v473_v31  ;;  %v494_v39 = vmul.f32 %v2239_v28, %v471_v32 }
 0x12f   : > { %v418_v40 = vpop.permute.xlu1 %417  ;;  %v413_v41 = vpop.permute.xlu0 %412 }
 0x130   : > { %v2245_v44 = vpack.c.bf16 %v496_v38, %v495_v36  ;;  %v2247_v45 = vpack.c.bf16 %v494_v39, %v493_v37  ;;  %v475_v46 = vmul.f32 %v1410_v33, %v418_v40  ;;  %v474_v47 = vmul.f32 %v1409_v34, %v413_v41  ;;  %v1732_v36 = vld [vmem:[#allocation12 + $0x8] sm:$0xff] (!%p1369_p5)   ;;  %v1733_v37 = vld [vmem:[#allocation12 + $0x10] sm:$0xff] (!%p1369_p5)   ;;  %v1734_v38 = vld [vmem:[#allocation12 + $0x18] sm:$0xff] (!%p1369_p5)  }
 0x131   : > { %1504 = vmatprep.subr.bf16.mxu0 (!%p1369_p5), %v1732_v36  ;;  %v1739_v39 = vld [vmem:[#allocation10] sm:$0xff] (!%p1369_p5)   ;;  %v1736_v40 = vld [vmem:[#allocation12 + $0x28] sm:$0xff] (!%p1369_p5)   ;;  %v1737_v41 = vld [vmem:[#allocation12 + $0x30] sm:$0xff] (!%p1369_p5)  }
 0x132   : > { %v498_v49 = vmul.f32 %v2239_v28, %v475_v46  ;;  %v497_v50 = vmul.f32 %v2239_v28, %v474_v47  ;;  %1550 = vmatprep.mubr.bf16.mxu1 (!%p1369_p5), %v2247_v45  ;;  %1505 = vmatpush3.bf16.msra.mxu0 (!%p1369_p5), %v1732_v36  ;;  %v1741_v46 = vld [vmem:[#allocation10 + $0x10] sm:$0xff] (!%p1369_p5)   ;;  %v1742_v47 = vld [vmem:[#allocation10 + $0x18] sm:$0xff] (!%p1369_p5)  }
 0x133   : > { %v428_v51 = vpop.permute.xlu1 %427  ;;  %v423_v52 = vpop.permute.xlu0 %422  ;;  %1506 = vmatprep.subr.bf16.mxu0 (!%p1369_p5), %v1733_v37  ;;  %1518 = vmatprep.mubr.bf16.mxu0 (!%p1369_p5), %v1739_v39 }
 0x134   : > { %v2251_v54 = vpack.c.bf16 %v498_v49, %v497_v50  ;;  %v477_v55 = vmul.f32 %v1414_v42, %v428_v51  ;;  %v476_v56 = vmul.f32 %v1413_v43, %v423_v52  ;;  %v1738_v42 = vld [vmem:[#allocation12 + $0x38] sm:$0xff] (!%p1369_p5)   ;;  %v1740_v43 = vld [vmem:[#allocation10 + $0x8] sm:$0xff] (!%p1369_p5)   ;;  %v1745_v50 = vld [vmem:[#allocation10 + $0x30] sm:$0xff] (!%p1369_p5)  }
 0x135   : > { %v1744_v49 = vld [vmem:[#allocation10 + $0x28] sm:$0xff] (!%p1369_p5)   ;;  %v1746_v51 = vld [vmem:[#allocation10 + $0x38] sm:$0xff] (!%p1369_p5)  }
 0x136   : > { %v500_v59 = vmul.f32 %v2239_v28, %v477_v55  ;;  %v499_v60 = vmul.f32 %v2239_v28, %v476_v56  ;;  %1507 = vmatpush3.bf16.msra.mxu0 (!%p1369_p5), %v1733_v37 }
 0x137   : > { %v438_v61 = vpop.permute.xlu1 %437  ;;  %v433_v62 = vpop.permute.xlu0 %432  ;;  %1508 = vmatprep.subr.bf16.mxu0 (!%p1369_p5), %v1734_v38 }
 0x138   : > { %v2255_v0 = vpack.c.bf16 %v500_v59, %v499_v60  ;;  %v479_v1 = vmul.f32 %v1418_v53, %v438_v61  ;;  %v478_v2 = vmul.f32 %v1417_v57, %v433_v62 }
 0x13a   : > { %v502_v5 = vmul.f32 %v2239_v28, %v479_v1  ;;  %v501_v6 = vmul.f32 %v2239_v28, %v478_v2  ;;  %1509 = vmatpush3.bf16.msra.mxu0 (!%p1369_p5), %v1734_v38 }
 0x13b   : > { %v448_v7 = vpop.permute.xlu1 %447  ;;  %v443_v8 = vpop.permute.xlu0 %442 }
 0x13c   : > { %v2259_v10 = vpack.c.bf16 %v502_v5, %v501_v6  ;;  %v481_v11 = vmul.f32 %v1422_v63, %v448_v7  ;;  %v480_v12 = vmul.f32 %v1421_v3, %v443_v8 }
 0x13e   : > { %v504_v15 = vmul.f32 %v2239_v28, %v481_v11  ;;  %v503_v16 = vmul.f32 %v2239_v28, %v480_v12 }
 0x13f   : > { %v458_v17 = vpop.permute.xlu1 %457  ;;  %v453_v18 = vpop.permute.xlu0 %452 }
 0x140   : > { %v2263_v20 = vpack.c.bf16 %v504_v15, %v503_v16  ;;  %v483_v21 = vmul.f32 %v1426_v9, %v458_v17  ;;  %v482_v22 = vmul.f32 %v1425_v13, %v453_v18 }
 0x142   : > { %v506_v24 = vmul.f32 %v2239_v28, %v483_v21  ;;  %v505_v25 = vmul.f32 %v2239_v28, %v482_v22  ;;  %520 = sbr.rel (%p1369_p5) target bundleno = 836 (0x344), region = 72 }
 0x143   : > { %v468_v26 = vpop.permute.xlu1 %467  ;;  %v463_v27 = vpop.permute.xlu0 %462 }
 0x144   : > { %v2267_v29 = vpack.c.bf16 %v506_v24, %v505_v25  ;;  %v485_v30 = vmul.f32 %v1430_v19, %v468_v26  ;;  %v484_v31 = vmul.f32 %v1429_v23, %v463_v27 }
 0x146   : > { %v508_v32 = vmul.f32 %v2239_v28, %v485_v30  ;;  %v507_v33 = vmul.f32 %v2239_v28, %v484_v31  ;;  %v1735_v28 = vld [vmem:[#allocation12 + $0x20] sm:$0xff] (!%p1369_p5)  }
 0x147   : > { %1510 = vmatprep.subr.bf16.mxu0 (!%p1369_p5), %v1735_v28 }
 0x148   : > { %v2271_v34 = vpack.c.bf16 %v508_v32, %v507_v33  ;;  %1511 = vmatpush3.bf16.msra.mxu0 (!%p1369_p5), %v1735_v28 }
 0x149   : > { %1512 = vmatprep.subr.bf16.mxu0 %v1736_v40 }
 0x14c   : > { %1513 = vmatpush3.bf16.msra.mxu0 %v1736_v40 }
 0x14d   : > { %1514 = vmatprep.subr.bf16.mxu0 %v1737_v41 }
 0x150   : > { %1515 = vmatpush3.bf16.msra.mxu0 %v1737_v41 }
 0x151   : > { %1516 = vmatprep.subr.bf16.mxu0 %v1738_v42 }
 0x154   : > { %1517 = vmatpush3.bf16.msra.mxu0 %v1738_v42 }
 0x157   : > { %1519 = vmatmul.mubr.bf16.vlgmr.msra.gmra.mrb[0].mxu0 %v1740_v43 }
 0x158   : > { %1522 = vmatprep.mubr.bf16.mxu0 %v1741_v46 }
 0x15f   : > { %1523 = vmatmul.mubr.bf16.gmra.mrb[4].mxu0 %v1742_v47 }
 0x160   : > { %1526 = vmatprep.mubr.bf16.mxu0 %v1743_v48 }
 0x167   : > { %1527 = vmatmul.mubr.bf16.gmra.mrb[8].mxu0 %v1744_v49 }
 0x168   : > { %1530 = vmatprep.mubr.bf16.mxu0 %v1745_v50 }
 0x16f   : > { %1531 = vmatmul.mubr.bf16.gmra.mrb[12].mxu0 %v1746_v51 }
 0x22a   : > { %v1520_v52 = vpop.f32.mrb[0].mxu0 }
 0x22b   : > { %v687_v53 = vpop.f32.mrb[1].mxu0 }
 0x22c   : > { %v1521_v55 = vpop.f32.mrb[2].mxu0 }
 0x22d   : > { %v751_v56 = vpack.c.bf16 %v1521_v55, %v1520_v52  ;;  %v690_v57 = vpop.f32.mrb[3].mxu0 }
 0x22e   : > { %v750_v58 = vpack.c.bf16 %v690_v57, %v687_v53 }
 0x230   : > { %1534 = vmatprep.subr.bf16.mxu1 %v750_v58 }
 0x231   : > { %1535 = vmatpush3.bf16.msra.mxu1 %v750_v58 }
 0x232   : > { %v1524_v59 = vpop.f32.mrb[4].mxu0  ;;  %1536 = vmatprep.subr.bf16.mxu1 %v751_v56 }
 0x233   : > { %v703_v60 = vpop.f32.mrb[5].mxu0 }
 0x234   : > { %v1525_v61 = vpop.f32.mrb[6].mxu0 }
 0x235   : > { %v753_v62 = vpack.c.bf16 %v1525_v61, %v1524_v59  ;;  %v706_v63 = vpop.f32.mrb[7].mxu0  ;;  %1537 = vmatpush3.bf16.msra.mxu1 %v751_v56 }
 0x236   : > { %v752_v1 = vpack.c.bf16 %v706_v63, %v703_v60 }
 0x238   : > { %1538 = vmatprep.subr.bf16.mxu1 %v752_v1 }
 0x239   : > { %1539 = vmatpush3.bf16.msra.mxu1 %v752_v1 }
 0x23a   : > { %v1528_v2 = vpop.f32.mrb[8].mxu0  ;;  %1540 = vmatprep.subr.bf16.mxu1 %v753_v62 }
 0x23b   : > { %v719_v3 = vpop.f32.mrb[9].mxu0 }
 0x23c   : > { %v1529_v4 = vpop.f32.mrb[10].mxu0 }
 0x23d   : > { %v755_v5 = vpack.c.bf16 %v1529_v4, %v1528_v2  ;;  %v722_v6 = vpop.f32.mrb[11].mxu0  ;;  %1541 = vmatpush3.bf16.msra.mxu1 %v753_v62 }
 0x23e   : > { %v754_v7 = vpack.c.bf16 %v722_v6, %v719_v3 }
 0x240   : > { %1542 = vmatprep.subr.bf16.mxu1 %v754_v7 }
 0x241   : > { %1543 = vmatpush3.bf16.msra.mxu1 %v754_v7 }
 0x242   : > { %v1532_v8 = vpop.f32.mrb[12].mxu0  ;;  %1544 = vmatprep.subr.bf16.mxu1 %v755_v5 }
 0x243   : > { %v735_v9 = vpop.f32.mrb[13].mxu0 }
 0x244   : > { %v1533_v11 = vpop.f32.mrb[14].mxu0 }
 0x245   : > { %v757_v12 = vpack.c.bf16 %v1533_v11, %v1532_v8  ;;  %v738_v13 = vpop.f32.mrb[15].mxu0  ;;  %1545 = vmatpush3.bf16.msra.mxu1 %v755_v5 }
 0x246   : > { %v756_v14 = vpack.c.bf16 %v738_v13, %v735_v9 }
 0x248   : > { %1546 = vmatprep.subr.bf16.mxu1 %v756_v14 }
 0x249   : > { %1547 = vmatpush3.bf16.msra.mxu1 %v756_v14 }
 0x24a   : > { %1548 = vmatprep.subr.bf16.mxu1 %v757_v12 }
 0x24d   : > { %1549 = vmatpush3.bf16.msra.mxu1 %v757_v12 }
 0x250   : > { %1551 = vmatmul.mubr.bf16.vlgmr.msra.gmra.mrb[0].mxu1 %v2245_v44 }
 0x251   : > { %1554 = vmatprep.mubr.bf16.mxu1 %v2251_v54 }
 0x258   : > { %1555 = vmatmul.mubr.bf16.gmra.mrb[4].mxu1 %v2255_v0 }
 0x259   : > { %1558 = vmatprep.mubr.bf16.mxu1 %v2259_v10 }
 0x260   : > { %1559 = vmatmul.mubr.bf16.gmra.mrb[8].mxu1 %v2263_v20 }
 0x261   : > { %1562 = vmatprep.mubr.bf16.mxu1 %v2267_v29 }
 0x268   : > { %1563 = vmatmul.mubr.bf16.gmra.mrb[12].mxu1 %v2271_v34 }
 0x323   : > { %v1552_v15 = vpop.f32.mrb[0].mxu1 }
 0x324   : > { %v808_v16 = vpop.f32.mrb[1].mxu1  ;;  %v873_v18 = vmax.f32 %v1552_v15, 0.0 }
 0x325   : > { %v1553_v17 = vpop.f32.mrb[2].mxu1  ;;  %v871_v22 = vmax.f32 %v808_v16, 0.0 }
 0x326   : > { %v874_v19 = vmax.f32 %v1553_v17, 0.0  ;;  %v811_v21 = vpop.f32.mrb[3].mxu1 }
 0x327   : > { %v872_v23 = vmax.f32 %v811_v21, 0.0 }
 0x328   : > { %v888_v24 = vpack.c.bf16 %v874_v19, %v873_v18 }
 0x329   : > { %v887_v25 = vpack.c.bf16 %v872_v23, %v871_v22 }
 0x32a   : > { %900 = vst [vmem:[#allocation2 + $0x8] sm:$0xff] %v888_v24 }
 0x32b   : > { %899 = vst [vmem:[#allocation2] sm:$0xff] %v887_v25  ;;  %v1556_v26 = vpop.f32.mrb[4].mxu1 }
 0x32c   : > { %v824_v27 = vpop.f32.mrb[5].mxu1  ;;  %v877_v31 = vmax.f32 %v1556_v26, 0.0 }
 0x32d   : > { %v1557_v30 = vpop.f32.mrb[6].mxu1  ;;  %v875_v35 = vmax.f32 %v824_v27, 0.0 }
 0x32e   : > { %v878_v32 = vmax.f32 %v1557_v30, 0.0  ;;  %v827_v33 = vpop.f32.mrb[7].mxu1 }
 0x32f   : > { %v876_v36 = vmax.f32 %v827_v33, 0.0 }
 0x330   : > { %v890_v37 = vpack.c.bf16 %v878_v32, %v877_v31 }
 0x331   : > { %v889_v38 = vpack.c.bf16 %v876_v36, %v875_v35 }
 0x332   : > { %902 = vst [vmem:[#allocation2 + $0x18] sm:$0xff] %v890_v37 }
 0x333   : > { %901 = vst [vmem:[#allocation2 + $0x10] sm:$0xff] %v889_v38  ;;  %v1560_v39 = vpop.f32.mrb[8].mxu1 }
 0x334   : > { %v840_v28 = vpop.f32.mrb[9].mxu1  ;;  %v881_v41 = vmax.f32 %v1560_v39, 0.0 }
 0x335   : > { %v1561_v40 = vpop.f32.mrb[10].mxu1  ;;  %v879_v46 = vmax.f32 %v840_v28, 0.0 }
 0x336   : > { %v882_v42 = vmax.f32 %v1561_v40, 0.0  ;;  %v843_v43 = vpop.f32.mrb[11].mxu1 }
 0x337   : > { %v880_v47 = vmax.f32 %v843_v43, 0.0 }
 0x338   : > { %v892_v48 = vpack.c.bf16 %v882_v42, %v881_v41 }
 0x339   : > { %v891_v49 = vpack.c.bf16 %v880_v47, %v879_v46 }
 0x33a   : > { %904 = vst [vmem:[#allocation2 + $0x28] sm:$0xff] %v892_v48 }
 0x33b   : > { %903 = vst [vmem:[#allocation2 + $0x20] sm:$0xff] %v891_v49  ;;  %v1564_v50 = vpop.f32.mrb[12].mxu1 }
 0x33c   : > { %v856_v51 = vpop.f32.mrb[13].mxu1  ;;  %v885_v53 = vmax.f32 %v1564_v50, 0.0 }
 0x33d   : > { %v1565_v52 = vpop.f32.mrb[14].mxu1  ;;  %v883_v57 = vmax.f32 %v856_v51, 0.0 }
 0x33e   : > { %v886_v55 = vmax.f32 %v1565_v52, 0.0  ;;  %v859_v56 = vpop.f32.mrb[15].mxu1 }
 0x33f   : > { %v884_v58 = vmax.f32 %v859_v56, 0.0 }
 0x340   : > { %v894_v59 = vpack.c.bf16 %v886_v55, %v885_v53 }
 0x341   : > { %v893_v60 = vpack.c.bf16 %v884_v58, %v883_v57 }
 0x342   : > { %906 = vst [vmem:[#allocation2 + $0x38] sm:$0xff] %v894_v59 }
 0x343   : > { %905 = vst [vmem:[#allocation2 + $0x30] sm:$0xff] %v893_v60 }
 0x344 PF: > { %p1386_p3 = scmp.ne.s32.totalorder %s1983_s21, 1 }
 0x345   : > { %v1747_v61 = vld [vmem:[#allocation13] sm:$0xff] (!%p1386_p3)   ;;  %1614 = vmatprep.mubr.bf16.mxu1 (!%p1386_p3), %v2247_v45  ;;  %v1748_v62 = vld [vmem:[#allocation13 + $0x8] sm:$0xff] (!%p1386_p3)   ;;  %v1749_v63 = vld [vmem:[#allocation13 + $0x10] sm:$0xff] (!%p1386_p3)  }
 0x346   : > { %910 = sbr.rel (%p1386_p3) target bundleno = 1361 (0x551), region = 80  ;;  %1566 = vmatprep.subr.bf16.mxu0 (!%p1386_p3), %v1747_v61  ;;  %v1750_v1 = vld [vmem:[#allocation13 + $0x18] sm:$0xff] (!%p1386_p3)   ;;  %v1751_v3 = vld [vmem:[#allocation13 + $0x20] sm:$0xff] (!%p1386_p3)   ;;  %v1752_v4 = vld [vmem:[#allocation13 + $0x28] sm:$0xff] (!%p1386_p3)  }
 0x347   : > { %1567 = vmatpush3.bf16.msra.mxu0 (!%p1386_p3), %v1747_v61  ;;  %v915_v2 = vld [vmem:[#allocation2] sm:$0xff] (!%p1386_p3)  ;;  %v1753_v5 = vld [vmem:[#allocation13 + $0x30] sm:$0xff] (!%p1386_p3)   ;;  %v916_v6 = vld [vmem:[#allocation2 + $0x8] sm:$0xff] (!%p1386_p3) }
 0x348   : > { %1568 = vmatprep.subr.bf16.mxu0 (!%p1386_p3), %v1748_v62  ;;  %1582 = vmatprep.mubr.bf16.mxu0 (!%p1386_p3), %v915_v2  ;;  %v1754_v45 = vld [vmem:[#allocation13 + $0x38] sm:$0xff] (!%p1386_p3)   ;;  %v917_v7 = vld [vmem:[#allocation2 + $0x10] sm:$0xff] (!%p1386_p3)  ;;  %v920_v11 = vld [vmem:[#allocation2 + $0x28] sm:$0xff] (!%p1386_p3) }
 0x349   : > { %v918_v8 = vld [vmem:[#allocation2 + $0x18] sm:$0xff] (!%p1386_p3)  ;;  %v919_v9 = vld [vmem:[#allocation2 + $0x20] sm:$0xff] (!%p1386_p3) }
 0x34a   : > { %v921_v12 = vld [vmem:[#allocation2 + $0x30] sm:$0xff] (!%p1386_p3)  ;;  %v922_v13 = vld [vmem:[#allocation2 + $0x38] sm:$0xff] (!%p1386_p3) }
 0x34b   : > { %1569 = vmatpush3.bf16.msra.mxu0 (!%p1386_p3), %v1748_v62 }
 0x34c   : > { %1570 = vmatprep.subr.bf16.mxu0 (!%p1386_p3), %v1749_v63 }
 0x34f   : > { %1571 = vmatpush3.bf16.msra.mxu0 %v1749_v63 }
 0x350   : > { %1572 = vmatprep.subr.bf16.mxu0 %v1750_v1 }
 0x353   : > { %1573 = vmatpush3.bf16.msra.mxu0 %v1750_v1 }
 0x354   : > { %1574 = vmatprep.subr.bf16.mxu0 %v1751_v3 }
 0x357   : > { %1575 = vmatpush3.bf16.msra.mxu0 %v1751_v3 }
 0x358   : > { %1576 = vmatprep.subr.bf16.mxu0 %v1752_v4 }
 0x35b   : > { %1577 = vmatpush3.bf16.msra.mxu0 %v1752_v4 }
 0x35c   : > { %1578 = vmatprep.subr.bf16.mxu0 %v1753_v5 }
 0x35f   : > { %1579 = vmatpush3.bf16.msra.mxu0 %v1753_v5 }
 0x360   : > { %1580 = vmatprep.subr.bf16.mxu0 %v1754_v45 }
 0x363   : > { %1581 = vmatpush3.bf16.msra.mxu0 %v1754_v45 }
 0x366   : > { %1583 = vmatmul.mubr.bf16.vlgmr.msra.gmra.mrb[0].mxu0 %v916_v6 }
 0x367   : > { %1586 = vmatprep.mubr.bf16.mxu0 %v917_v7 }
 0x36e   : > { %1587 = vmatmul.mubr.bf16.gmra.mrb[4].mxu0 %v918_v8 }
 0x36f   : > { %1590 = vmatprep.mubr.bf16.mxu0 %v919_v9 }
 0x376   : > { %1591 = vmatmul.mubr.bf16.gmra.mrb[8].mxu0 %v920_v11 }
 0x377   : > { %1594 = vmatprep.mubr.bf16.mxu0 %v921_v12 }
 0x37e   : > { %1595 = vmatmul.mubr.bf16.gmra.mrb[12].mxu0 %v922_v13 }
 0x439   : > { %v1584_v14 = vpop.f32.mrb[0].mxu0 }
 0x43a   : > { %v1021_v15 = vpop.f32.mrb[1].mxu0 }
 0x43b   : > { %v1585_v16 = vpop.f32.mrb[2].mxu0 }
 0x43c   : > { %v1085_v17 = vpack.c.bf16 %v1585_v16, %v1584_v14  ;;  %v1024_v18 = vpop.f32.mrb[3].mxu0 }
 0x43d   : > { %v1084_v19 = vpack.c.bf16 %v1024_v18, %v1021_v15 }
 0x43f   : > { %1598 = vmatprep.subr.bf16.mxu1 %v1084_v19 }
 0x440   : > { %1599 = vmatpush3.bf16.msra.mxu1 %v1084_v19 }
 0x441   : > { %v1588_v21 = vpop.f32.mrb[4].mxu0  ;;  %1600 = vmatprep.subr.bf16.mxu1 %v1085_v17 }
 0x442   : > { %v1037_v22 = vpop.f32.mrb[5].mxu0 }
 0x443   : > { %v1589_v23 = vpop.f32.mrb[6].mxu0 }
 0x444   : > { %v1087_v24 = vpack.c.bf16 %v1589_v23, %v1588_v21  ;;  %v1040_v25 = vpop.f32.mrb[7].mxu0  ;;  %1601 = vmatpush3.bf16.msra.mxu1 %v1085_v17 }
 0x445   : > { %v1086_v26 = vpack.c.bf16 %v1040_v25, %v1037_v22 }
 0x447   : > { %1602 = vmatprep.subr.bf16.mxu1 %v1086_v26 }
 0x448   : > { %1603 = vmatpush3.bf16.msra.mxu1 %v1086_v26 }
 0x449   : > { %v1592_v27 = vpop.f32.mrb[8].mxu0  ;;  %1604 = vmatprep.subr.bf16.mxu1 %v1087_v24 }
 0x44a   : > { %v1053_v30 = vpop.f32.mrb[9].mxu0 }
 0x44b   : > { %v1593_v31 = vpop.f32.mrb[10].mxu0 }
 0x44c   : > { %v1089_v32 = vpack.c.bf16 %v1593_v31, %v1592_v27  ;;  %v1056_v33 = vpop.f32.mrb[11].mxu0  ;;  %1605 = vmatpush3.bf16.msra.mxu1 %v1087_v24 }
 0x44d   : > { %v1088_v35 = vpack.c.bf16 %v1056_v33, %v1053_v30 }
 0x44f   : > { %1606 = vmatprep.subr.bf16.mxu1 %v1088_v35 }
 0x450   : > { %1607 = vmatpush3.bf16.msra.mxu1 %v1088_v35 }
 0x451   : > { %v1596_v36 = vpop.f32.mrb[12].mxu0  ;;  %1608 = vmatprep.subr.bf16.mxu1 %v1089_v32 }
 0x452   : > { %v1069_v37 = vpop.f32.mrb[13].mxu0 }
 0x453   : > { %v1597_v38 = vpop.f32.mrb[14].mxu0 }
 0x454   : > { %v1091_v39 = vpack.c.bf16 %v1597_v38, %v1596_v36  ;;  %v1072_v28 = vpop.f32.mrb[15].mxu0  ;;  %1609 = vmatpush3.bf16.msra.mxu1 %v1089_v32 }
 0x455   : > { %v1090_v40 = vpack.c.bf16 %v1072_v28, %v1069_v37 }
 0x457   : > { %1610 = vmatprep.subr.bf16.mxu1 %v1090_v40 }
 0x458   : > { %1611 = vmatpush3.bf16.msra.mxu1 %v1090_v40 }
 0x459   : > { %1612 = vmatprep.subr.bf16.mxu1 %v1091_v39 }
 0x45c   : > { %1613 = vmatpush3.bf16.msra.mxu1 %v1091_v39 }
 0x45f   : > { %1615 = vmatmul.mubr.bf16.vlgmr.msra.gmra.mrb[0].mxu1 %v2245_v44 }
 0x460   : > { %1618 = vmatprep.mubr.bf16.mxu1 %v2251_v54 }
 0x467   : > { %1619 = vmatmul.mubr.bf16.gmra.mrb[4].mxu1 %v2255_v0 }
 0x468   : > { %1622 = vmatprep.mubr.bf16.mxu1 %v2259_v10 }
 0x46f   : > { %1623 = vmatmul.mubr.bf16.gmra.mrb[8].mxu1 %v2263_v20 }
 0x470   : > { %1626 = vmatprep.mubr.bf16.mxu1 %v2267_v29 }
 0x477   : > { %1627 = vmatmul.mubr.bf16.gmra.mrb[12].mxu1 %v2271_v34 }
 0x532   : > { %v1616_v41 = vpop.f32.mrb[0].mxu1 }
 0x533   : > { %v1207_v42 = vmax.f32 %v1616_v41, 0.0  ;;  %v1142_v43 = vpop.f32.mrb[1].mxu1 }
 0x534   : > { %v1205_v46 = vmax.f32 %v1142_v43, 0.0  ;;  %v1617_v47 = vpop.f32.mrb[2].mxu1 }
 0x535   : > { %1223 = vst [vmem:[#allocation15 + $0x10] sm:$0xff] %v1207_v42  ;;  %v1208_v48 = vmax.f32 %v1617_v47, 0.0  ;;  %v1145_v44 = vpop.f32.mrb[3].mxu1 }
 0x536   : > { %1221 = vst [vmem:[#allocation15] sm:$0xff] %v1205_v46  ;;  %v1206_v54 = vmax.f32 %v1145_v44, 0.0 }
 0x537   : > { %1224 = vst [vmem:[#allocation15 + $0x18] sm:$0xff] %v1208_v48 }
 0x538   : > { %1222 = vst [vmem:[#allocation15 + $0x8] sm:$0xff] %v1206_v54 }
 0x53a   : > { %v1620_v0 = vpop.f32.mrb[4].mxu1 }
 0x53b   : > { %v1211_v10 = vmax.f32 %v1620_v0, 0.0  ;;  %v1158_v49 = vpop.f32.mrb[5].mxu1 }
 0x53c   : > { %v1209_v20 = vmax.f32 %v1158_v49, 0.0  ;;  %v1621_v50 = vpop.f32.mrb[6].mxu1 }
 0x53d   : > { %1227 = vst [vmem:[#allocation15 + $0x30] sm:$0xff] %v1211_v10  ;;  %v1212_v29 = vmax.f32 %v1621_v50, 0.0  ;;  %v1161_v34 = vpop.f32.mrb[7].mxu1 }
 0x53e   : > { %1225 = vst [vmem:[#allocation15 + $0x20] sm:$0xff] %v1209_v20  ;;  %v1210_v51 = vmax.f32 %v1161_v34, 0.0 }
 0x53f   : > { %1228 = vst [vmem:[#allocation15 + $0x38] sm:$0xff] %v1212_v29 }
 0x540   : > { %1226 = vst [vmem:[#allocation15 + $0x28] sm:$0xff] %v1210_v51 }
 0x542   : > { %v1624_v52 = vpop.f32.mrb[8].mxu1 }
 0x543   : > { %v1215_v53 = vmax.f32 %v1624_v52, 0.0  ;;  %v1174_v55 = vpop.f32.mrb[9].mxu1 }
 0x544   : > { %v1213_v56 = vmax.f32 %v1174_v55, 0.0  ;;  %v1625_v57 = vpop.f32.mrb[10].mxu1 }
 0x545   : > { %1231 = vst [vmem:[#allocation15 + $0x50] sm:$0xff] %v1215_v53  ;;  %v1216_v58 = vmax.f32 %v1625_v57, 0.0  ;;  %v1177_v59 = vpop.f32.mrb[11].mxu1 }
 0x546   : > { %1229 = vst [vmem:[#allocation15 + $0x40] sm:$0xff] %v1213_v56  ;;  %v1214_v60 = vmax.f32 %v1177_v59, 0.0 }
 0x547   : > { %1232 = vst [vmem:[#allocation15 + $0x58] sm:$0xff] %v1216_v58 }
 0x548   : > { %1230 = vst [vmem:[#allocation15 + $0x48] sm:$0xff] %v1214_v60 }
 0x54a   : > { %v1628_v61 = vpop.f32.mrb[12].mxu1 }
 0x54b   : > { %v1219_v62 = vmax.f32 %v1628_v61, 0.0  ;;  %v1190_v63 = vpop.f32.mrb[13].mxu1 }
 0x54c   : > { %v1217_v1 = vmax.f32 %v1190_v63, 0.0  ;;  %v1629_v2 = vpop.f32.mrb[14].mxu1 }
 0x54d   : > { %1235 = vst [vmem:[#allocation15 + $0x70] sm:$0xff] %v1219_v62  ;;  %v1220_v3 = vmax.f32 %v1629_v2, 0.0  ;;  %v1193_v4 = vpop.f32.mrb[15].mxu1 }
 0x54e   : > { %1233 = vst [vmem:[#allocation15 + $0x60] sm:$0xff] %v1217_v1  ;;  %v1218_v5 = vmax.f32 %v1193_v4, 0.0 }
 0x54f   : > { %1236 = vst [vmem:[#allocation15 + $0x78] sm:$0xff] %v1220_v3 }
 0x550   : > { %1234 = vst [vmem:[#allocation15 + $0x68] sm:$0xff] %v1218_v5 }
 0x551 PF: > { %p2293_p12 = scmp.eq.s32.totalorder %s1353_s26, 1  ;;  %s2004_s27 = smov [#allocation15]  }
 0x552   : > { %s1246_s28 = sshll.u32 %s2004_s27, 4  ;;  %s1247_s28 = int_to_ptr.vmem [resolvable:$true] %s1246_s28 }
 0x553   : > { %s1923_s29 = scalar_lea.vmem %s1247_s28, 2048  ;;  %p1930_p4 = scmp.lt.s32.totalorder %s1247_s28, %s1247_s28 }
 0x554   : > { %p1924_p13 = scmp.ne.s32.totalorder %s1247_s28, %s1923_s29  ;;  %p1931_p6 = scmp.lt.s32.totalorder %s1923_s29, %s1923_s29 }
 0x556   : > { %p1925_p0 = pnand %p1924_p13, %p2293_p12  ;;  %p1932_p8 = por %p1931_p6, %p1930_p4 }
 0x558   : > { %p1926_p1 = pneg %p1925_p0 }
 0x55a   : > { %p1933_p9 = pnand %p1932_p8, %p1926_p1 }
 0x55c   : > { %1936 = shalt.err (!%p1933_p9)
}
 0x55d   : > { %s1937_s26 = scalar_lea.hbm %s2334_s6, 2048 }
 0x55e   : > { %p1938_p10 = scmp.ne.s32.totalorder %s2334_s6, %s1937_s26  ;;  %p1943_p7 = scmp.lt.u32.totalorder %s1937_s26, %s2334_s6 }
 0x560   : > { %p1939_p11 = pnand %p1938_p10, %p2293_p12 }
 0x562   : > { %p1940_p2 = pneg %p1939_p11 }
 0x564   : > { %p1945_p5 = pnand %p1943_p7, %p1940_p2 }
 0x566   : > { %1948 = shalt.err (!%p1945_p5)
}
 0x567   : > { %s2005_s8 = smov 128   ;;  %s2006_s10 = smov 8  }
 0x568   : > { %1655 = dma.vmem_to_hbm [thread:$0]  (%p2293_p12), %s1247_s28, 2048, %s2334_s6, [#allocation6], %s2005_s8, %s2005_s8, %s2006_s10  }
 0x569   : > { %1978 = dma.done.wait (%p2293_p12), [#allocation6], 2048  }
 0x56a   : > { %1980 = vsyncadd (%p2293_p12), [#allocation6], 4294965248 }
 0x56b PF: > { %s21_s23 = sadd.s32 1, %s1991_s23   ;;  %s2345_s21 = smov %s1987_s22 }
 0x56c   : > { %p18_p3 = scmp.ge.s32.totalorder %s21_s23, 4   ;;  %s2346_s22 = smov %s2348_s18 }
 0x56e   :  { %20 = sbr.rel (!%p18_p3) target bundleno = 6 (0x6), region = 113 }
 0x575   :  { %1262 = vsyncpa [#allocation5], 1 }
 0x576   :  { %1264 = vsyncpa [#allocation5 + $0x1], 1 }
 0x577   :  { %1265 = vsyncpa [#allocation8], 1 }
 0x578   :  { %1266 = vsyncpa [#allocation11], 1 }
 0x579   :  { %1267 = vsyncpa [#allocation14], 1 }
 0x57a   :  { %1268 = vsyncpa [#allocation6], 1 }
 0x57b   :  { %1270 = vsyncpa [#allocation6 + $0x1], 1 }

</bundles_post_ra>
